<compile_context>
chip_gen: v6e
topology: v6e:2x2x1
jax: 0.10.0
libtpu: 0.0.40
codegen_flags: <defaults>
</compile_context>

<pallas_src>
import jax
import jax.numpy as jnp
from jax.experimental import pallas as pl
from jax.experimental.pallas import tpu as pltpu


def _conv_gemm_kernel(p_ref, w_ref, b_ref, o_ref, acc_ref):
    """acc(C_out,TM) += W(C_out,TK) @ P(TK,TM); bias + cast + store on last K step.

    p_ref  : (1, TK, TM)    im2col patch tile (M = OH*OW on lanes, dense)
    w_ref  : (C_out, TK)    reshaped conv weight tile
    b_ref  : (C_out, 1)     bias (f32)
    o_ref  : (1, C_out, TM) output tile (lane-dense, maps straight to NCHW)
    acc_ref: (C_out, TM)    f32 accumulator scratch
    """
    kk = pl.program_id(2)

    @pl.when(kk == 0)
    def _():
        acc_ref[...] = jnp.zeros_like(acc_ref)

    acc_ref[...] += jnp.dot(w_ref[...], p_ref[0],
                            preferred_element_type=jnp.float32)

    @pl.when(kk == pl.num_programs(2) - 1)
    def _():
        o_ref[0] = (acc_ref[...] + b_ref[...]).astype(o_ref.dtype)


def _round_up(x, m):
    return -(-x // m) * m


def _im2col(x_nchw, kh, kw, stride, padding):
    """(N, C_in, H, W) -> (N, C_in*KH*KW, OH*OW) patch matrix (layout plumbing only)."""
    n, c_in, h, w = x_nchw.shape
    oh = (h + 2 * padding - kh) // stride + 1
    ow = (w + 2 * padding - kw) // stride + 1
    xp = jnp.pad(x_nchw, ((0, 0), (0, 0), (padding, padding), (padding, padding)))
    taps = []
    for i in range(kh):
        h_stop = i + (oh - 1) * stride + 1
        for j in range(kw):
            w_stop = j + (ow - 1) * stride + 1
            taps.append(xp[:, :, i:h_stop:stride, j:w_stop:stride])  # (N,C_in,OH,OW)
    p = jnp.stack(taps, axis=2)                  # (N, C_in, KH*KW, OH, OW)
    # Flatten order (C_in major, tap minor) matches weight.reshape(C_out, C_in*KH*KW).
    return p.reshape(n, c_in * kh * kw, oh * ow), oh, ow


def _pick_tiles(m_pad, k_aligned, itemsize, n_batch):
    """Pick lane tile TM and contraction tile TK (VMEM-bounded, lane-dense)."""
    tm_candidates = [t for t in (1024, 512, 256, 128) if m_pad % t == 0]
    tm = tm_candidates[0]
    if n_batch == 1:
        # Prefer >=2 spatial tiles when batch==1 so both TCs get work.
        for t in tm_candidates:
            if m_pad // t >= 2:
                tm = t
                break
    # Single K step if the patch block stays small; otherwise tile K.
    if k_aligned * tm * itemsize <= (4 << 20):
        tk = k_aligned
    else:
        tk = 1024
    return tm, tk


def conv_layer_forward(x_nchw, weight_oihw, bias, *, stride, padding):
    """Equivalent of ConvLayer.forward(x) for NCHW input / OIHW weight."""
    n, c_in, h, w = x_nchw.shape
    c_out, c_in_w, kh, kw = weight_oihw.shape
    assert c_in == c_in_w

    # --- glue (plain JAX): im2col layout plumbing + parameter packing -------
    patches, oh, ow = _im2col(x_nchw, kh, kw, stride, padding)   # (N, K, M)
    m = oh * ow
    k = c_in * kh * kw
    itemsize = jnp.dtype(x_nchw.dtype).itemsize
    sub_align = {1: 32, 2: 16}.get(itemsize, 8)     # sublane packing per dtype

    m_pad = _round_up(m, 128)                        # lane-dense M (zero cols inert)
    k_aligned = _round_up(k, sub_align)
    tm, tk = _pick_tiles(m_pad, k_aligned, itemsize, n)
    k_pad = _round_up(k, tk)                         # zero K rows are inert

    if m_pad != m or k_pad != k:
        patches = jnp.pad(patches, ((0, 0), (0, k_pad - k), (0, m_pad - m)))
    w2 = weight_oihw.reshape(c_out, k).astype(x_nchw.dtype)
    if k_pad != k:
        w2 = jnp.pad(w2, ((0, 0), (0, k_pad - k)))
    b2 = bias.reshape(c_out, 1).astype(jnp.float32)

    grid = (n, m_pad // tm, k_pad // tk)

    cost = pl.CostEstimate(
        flops=2 * n * m_pad * k_pad * c_out,
        transcendentals=0,
        bytes_accessed=(patches.size + n * (m_pad // tm) * w2.size) * itemsize
                        + b2.size * 4 + n * c_out * m_pad * itemsize,
    )

    out_flat = pl.pallas_call(
        _conv_gemm_kernel,
        out_shape=jax.ShapeDtypeStruct((n, c_out, m_pad), x_nchw.dtype),
        grid_spec=pltpu.PrefetchScalarGridSpec(
            num_scalar_prefetch=0,
            grid=grid,
            in_specs=[
                pl.BlockSpec((1, tk, tm), lambda i, j, kk: (i, kk, j)),
                pl.BlockSpec((c_out, tk), lambda i, j, kk: (0, kk)),
                pl.BlockSpec((c_out, 1), lambda i, j, kk: (0, 0)),
            ],
            out_specs=pl.BlockSpec((1, c_out, tm), lambda i, j, kk: (i, 0, j)),
            scratch_shapes=[pltpu.VMEM((c_out, tm), jnp.float32)],
        ),
        compiler_params=pltpu.CompilerParams(
            dimension_semantics=("parallel", "parallel", "arbitrary")),
        cost_estimate=cost,
    )(patches, w2, b2)

    # --- glue: crop lane padding, (N, C_out, OH*OW) -> NCHW is a pure reshape
    return out_flat[:, :, :m].reshape(n, c_out, oh, ow)


def _init_conv_params(key, in_channels, out_channels, kernel_size):
    """Deterministic init mimicking PyTorch's default Conv2d init."""
    kw_key, kb_key = jax.random.split(key)
    fan_in = in_channels * kernel_size * kernel_size
    bound = 1.0 / jnp.sqrt(fan_in)
    weight = jax.random.uniform(
        kw_key, (out_channels, in_channels, kernel_size, kernel_size),
        minval=-bound, maxval=bound, dtype=jnp.float32)
    bias = jax.random.uniform(kb_key, (out_channels,),
                              minval=-bound, maxval=bound, dtype=jnp.float32)
    return weight, bias


if __name__ == "__main__":
    # ConvLayer(in_channels=4, out_channels=8, kernel_size=3, stride=1, padding=1)
    N, C_IN, H, W = 2, 4, 16, 16
    C_OUT, K, STRIDE, PAD = 8, 3, 1, 1

    key = jax.random.PRNGKey(0)
    kx, kp = jax.random.split(key)
    x = jax.random.normal(kx, (N, C_IN, H, W), dtype=jnp.float32)
    weight, bias = _init_conv_params(kp, C_IN, C_OUT, K)

    out = conv_layer_forward(x, weight, bias, stride=STRIDE, padding=PAD)
    out = jax.block_until_ready(out)

    # Reference check against XLA's conv (same semantics as nn.Conv2d).
    ref = jax.lax.conv_general_dilated(
        x, weight, window_strides=(STRIDE, STRIDE),
        padding=[(PAD, PAD), (PAD, PAD)],
        dimension_numbers=("NCHW", "OIHW", "NCHW"),
    ) + bias.reshape(1, C_OUT, 1, 1)

    assert out.shape == (N, C_OUT, H, W), out.shape
    assert jnp.allclose(out, ref, atol=1e-4, rtol=1e-4), "mismatch vs lax.conv reference"

    print("KERNEL_OK")
</pallas_src>

<mosaic_0001>
module attributes {stable_mosaic.version = 11 : i64} {
  func.func @_conv_gemm_kernel(%arg0: i32, %arg1: i32, %arg2: i32, %arg3: memref<1x40x256xf32, #tpu.memory_space<vmem>>, %arg4: memref<8x40xf32, #tpu.memory_space<vmem>>, %arg5: memref<8x1xf32, #tpu.memory_space<vmem>>, %arg6: memref<1x8x256xf32, #tpu.memory_space<vmem>>, %arg7: memref<8x256xf32, #tpu.memory_space<vmem>>) attributes {dimension_semantics = [#tpu.dimension_semantics<parallel>, #tpu.dimension_semantics<parallel>, #tpu.dimension_semantics<arbitrary>], iteration_bounds = array<i64: 2, 1, 1>, scalar_prefetch = 0 : i64, scratch_operands = 1 : i64, tpu.core_type = #tpu.core_type<tc>, window_params = [{transform_indices = @transform_0, window_bounds = array<i64: 1, 40, 256>}, {transform_indices = @transform_1, window_bounds = array<i64: 8, 40>}, {pipeline_mode = #tpu.pipeline_mode<synchronous>, transform_indices = @transform_2, window_bounds = array<i64: 8, 1>}, {transform_indices = @transform_3, window_bounds = array<i64: 1, 8, 256>}]} {
    %c0_i32 = arith.constant 0 : i32
    %0 = arith.cmpi eq, %arg2, %c0_i32 : i32
    %1 = arith.extui %0 : i1 to i32
    %c0_i32_0 = arith.constant 0 : i32
    %2 = arith.cmpi ne, %1, %c0_i32_0 : i32
    scf.if %2 {
      %cst_11 = arith.constant 0.000000e+00 : f32
      %13 = vector.broadcast %cst_11 : f32 to vector<8x256xf32>
      %c0_12 = arith.constant 0 : index
      %c0_13 = arith.constant 0 : index
      %14 = vector.load %arg7[%c0_12, %c0_13] : memref<8x256xf32, #tpu.memory_space<vmem>>, vector<8x256xf32>
      tpu.vector_store %arg7[%c0_12, %c0_13], %13 {strides = array<i32>} : memref<8x256xf32, #tpu.memory_space<vmem>>, vector<8x256xf32>,
    } else {
    }
    %c0 = arith.constant 0 : index
    %c0_1 = arith.constant 0 : index
    %3 = vector.load %arg7[%c0, %c0_1] : memref<8x256xf32, #tpu.memory_space<vmem>>, vector<8x256xf32>
    %c0_2 = arith.constant 0 : index
    %c0_3 = arith.constant 0 : index
    %4 = vector.load %arg4[%c0_2, %c0_3] : memref<8x40xf32, #tpu.memory_space<vmem>>, vector<8x40xf32>
    %c0_4 = arith.constant 0 : index
    %c0_5 = arith.constant 0 : index
    %c0_6 = arith.constant 0 : index
    %5 = vector.load %arg3[%c0_4, %c0_5, %c0_6] : memref<1x40x256xf32, #tpu.memory_space<vmem>>, vector<1x40x256xf32>
    %6 = vector.shape_cast %5 : vector<1x40x256xf32> to vector<40x256xf32>
    %cst = arith.constant dense<0.000000e+00> : vector<8x256xf32>
    %7 = tpu.matmul %4, %6, %cst {dimension_numbers = #tpu.dot_dimension_numbers<[1], [0], [0], [1], [0, 0, 1, 1], [], []>} : vector<8x40xf32>, vector<40x256xf32>, vector<8x256xf32> -> vector<8x256xf32>
    %8 = arith.addf %3, %7 : vector<8x256xf32>
    %c0_7 = arith.constant 0 : index
    %c0_8 = arith.constant 0 : index
    %9 = vector.load %arg7[%c0_7, %c0_8] : memref<8x256xf32, #tpu.memory_space<vmem>>, vector<8x256xf32>
    tpu.vector_store %arg7[%c0_7, %c0_8], %8 {strides = array<i32>} : memref<8x256xf32, #tpu.memory_space<vmem>>, vector<8x256xf32>,
    %c0_i32_9 = arith.constant 0 : i32
    %10 = arith.cmpi eq, %arg2, %c0_i32_9 : i32
    %11 = arith.extui %10 : i1 to i32
    %c0_i32_10 = arith.constant 0 : i32
    %12 = arith.cmpi ne, %11, %c0_i32_10 : i32
    scf.if %12 {
      %c0_11 = arith.constant 0 : index
      %c0_12 = arith.constant 0 : index
      %13 = vector.load %arg7[%c0_11, %c0_12] : memref<8x256xf32, #tpu.memory_space<vmem>>, vector<8x256xf32>
      %c0_13 = arith.constant 0 : index
      %c0_14 = arith.constant 0 : index
      %14 = vector.load %arg5[%c0_13, %c0_14] : memref<8x1xf32, #tpu.memory_space<vmem>>, vector<8x1xf32>
      %15 = vector.broadcast %14 : vector<8x1xf32> to vector<8x256xf32>
      %16 = arith.addf %13, %15 : vector<8x256xf32>
      %c0_15 = arith.constant 0 : index
      %c0_16 = arith.constant 0 : index
      %c0_17 = arith.constant 0 : index
      %17 = vector.load %arg6[%c0_15, %c0_16, %c0_17] : memref<1x8x256xf32, #tpu.memory_space<vmem>>, vector<1x8x256xf32>
      %18 = vector.shape_cast %17 : vector<1x8x256xf32> to vector<8x256xf32>
      %19 = vector.shape_cast %16 : vector<8x256xf32> to vector<1x8x256xf32>
      tpu.vector_store %arg6[%c0_15, %c0_16, %c0_17], %19 {strides = array<i32>} : memref<1x8x256xf32, #tpu.memory_space<vmem>>, vector<1x8x256xf32>,
    } else {
    }
    return
  }
  func.func @transform_0(%arg0: i32, %arg1: i32, %arg2: i32) -> (i32, i32, i32) {
    %c0_i32 = arith.constant 0 : i32
    return %arg0, %arg2, %arg1 : i32, i32, i32
  }
  func.func @transform_1(%arg0: i32, %arg1: i32, %arg2: i32) -> (i32, i32) {
    %c0_i32 = arith.constant 0 : i32
    %c0_i32_0 = arith.constant 0 : i32
    return %c0_i32, %arg2 : i32, i32
  }
  func.func @transform_2(%arg0: i32, %arg1: i32, %arg2: i32) -> (i32, i32) {
    %c0_i32 = arith.constant 0 : i32
    %c0_i32_0 = arith.constant 0 : i32
    %c0_i32_1 = arith.constant 0 : i32
    return %c0_i32, %c0_i32_0 : i32, i32
  }
  func.func @transform_3(%arg0: i32, %arg1: i32, %arg2: i32) -> (i32, i32, i32) {
    %c0_i32 = arith.constant 0 : i32
    %c0_i32_0 = arith.constant 0 : i32
    return %arg0, %c0_i32, %arg1 : i32, i32, i32
  }
}

</mosaic_0001>

<bundles_post_ra>
// kernel: tpu_custom_call.1
= control target key start
LH: loop header
LB: loop body
LE: loop exit
PB: predicated region body
PF: predicated region fallthrough
CT: control target
= control target key end

     0   :  { %8 = vsyncpa [#allocation4], 0  ;;  %s833_s0 = inlined_call_operand.hbm [shape: f32[2,40,256], index: 0, kind: input, shape index: {}]   ;;  %s834_s1 = inlined_call_operand.vmem [shape: f32[8,40], index: 1, kind: input, shape index: {}]   ;;  %s835_s2 = inlined_call_operand.vmem [shape: f32[8,1], index: 2, kind: input, shape index: {}]   ;;  %s836_s3 = inlined_call_operand.hbm [shape: f32[2,8,256], index: 3, kind: output, shape index: {}]  }
   0x1   :  { %10 = vsyncpa [#allocation4 + $0x1], 0 }
   0x2   :  { %11 = vsyncpa [#allocation5], 0 }
   0x3   :  { %13 = vsyncpa [#allocation5 + $0x1], 0  ;;  %s694_s12 = smov 0   ;;  %s696_s13 = smov 0  }
   0x4   :  { %s698_s14 = smov 0   ;;  %s700_s15 = smov 0  }
   0x5   :  { %s702_s16 = smov 0   ;;  %s704_s17 = smov 0  }
   0x6 LB: > { %s473_s18 = sadd.s32 4294967295, %s666_s17   ;;  %s474_s19 = sadd.s32 4294967294, %s666_s17   ;;  %s666_s17 = sphi %s704_s17, %s19_s17   ;;  %s662_s16 = sphi %s702_s16, %s847_s16   ;;  %s658_s15 = sphi %s700_s15, %s846_s15   ;;  %s654_s14 = sphi %s698_s14, %s845_s14   ;;  %s650_s13 = sphi %s696_s13, %s844_s13   ;;  %s646_s12 = sphi %s694_s12, %s843_s12  }
   0x7   : > { %s38_s20 = sadd.s32 1, %s662_s16  ;;  %s49_s21 = sadd.s32 1, %s654_s14 }
   0x8   : > { %p40_p0 = scmp.ge.s32.totalorder %s38_s20, 2  ;;  %p56_p1 = scmp.ne.s32.totalorder %s654_s14, %s650_s13 }
   0x9   : > { %p57_p2 = scmp.eq.s32.totalorder %s666_s17, 0  ;;  %p62_p3 = scmp.ne.s32.totalorder %s650_s13, %s646_s12 }
   0xa   : > { %s849_s20 = smov (%p40_p0, %s38_s20), 0  ;;  %p63_p5 = scmp.eq.s32.totalorder %s473_s18, 0 }
   0xb   : > { %p735_p4 = por %p57_p2, %p56_p1  ;;  %s42_s23 = ssub.s32 %s662_s16, %s849_s20 }
   0xc   : > { %p135_p6 = scmp.eq.s32.totalorder %s473_s18, 1  ;;  %p47_p7 = scmp.eq.s32.totalorder %s42_s23, 0 }
   0xd   : > { %p741_p8 = por %p63_p5, %p62_p3  ;;  %p141_p10 = scmp.eq.s32.totalorder %s474_s19, 1 }
   0xe   : > { %p745_p9 = por %p135_p6, %p56_p1  ;;  %p503_p13 = scmp.lt.s32.totalorder %s666_s17, 2 }
   0xf   : > { %s750_s26 = scalar_select %p47_p7, %s654_s14, %s49_s21  }
  0x10   : > { %p752_p11 = por %p141_p10, %p62_p3  ;;  %s171_s28 = sand.u32 1, %s654_s14  }
  0x11   : > { %s488_s29 = smul.u32 80, %s171_s28  ;;  %p762_p0 = pnand %p503_p13, %p735_p4 }
  0x12   : > { %s489_s30 = smul.u32 1280, %s662_s16  ;;  %p479_p1 = scmp.ge.s32.totalorder %s666_s17, 1 }
  0x13   : > { %s175_s8 = scalar_lea.vmem [#allocation3], %s488_s29  ;;  %s172_s10 = scalar_lea.sflag [#allocation4], %s171_s28 }
  0x14   : > { %s186_s7 = scalar_lea.hbm %s833_s0, %s489_s30  ;;  %s187_s9 = sshll.u32 %s175_s8, 4  ;;  %s188_s9 = int_to_ptr.vmem [resolvable:$true] %s187_s9 }
  0x15   : > { %p560_p2 = pneg %p762_p0  ;;  %s571_s11 = scalar_lea.vmem %s188_s9, 1280 }
  0x16   : > { %p572_p3 = scmp.ne.s32.totalorder %s188_s9, %s571_s11  ;;  %s668_s18 = smov [#allocation3]  }
  0x17   : > { %s576_s19 = sshll.u32 %s668_s18, 4  ;;  %s577_s19 = int_to_ptr.vmem [resolvable:$false] %s576_s19 }
  0x18   : > { %p574_p5 = pnand %p572_p3, %p560_p2  ;;  %s578_s21 = scalar_lea.vmem %s577_s19, 2560 }
  0x19   : > { %p579_p4 = scmp.lt.s32.totalorder %s188_s9, %s577_s19  ;;  %p580_p7 = scmp.lt.s32.totalorder %s578_s21, %s571_s11 }
  0x1a   : > { %p575_p6 = pneg %p574_p5 }
  0x1b   : > { %p581_p10 = por %p580_p7, %p579_p4 }
  0x1d   : > { %p582_p13 = pnand %p581_p10, %p575_p6 }
  0x1f   : > { %585 = shalt.err (!%p582_p13)
}
  0x20   : > { %s669_s22 = smov 256   ;;  %s670_s23 = smov 16  }
  0x21   : > { %498 = dma.hbm_to_vmem [thread:$0]  (!%p762_p0), %s186_s7, 1280, %s188_s9, %s172_s10, %s669_s22, %s669_s22, %s670_s23  }
  0x22   : > { %p195_p12 = scmp.lt.s32.totalorder %s666_s17, 3 }
  0x24   : > { %p196_p2 = pnand %p479_p1, %p195_p12 }
  0x25   : > { %s778_s28 = sand.u32 (!%p196_p2), 1, %s650_s13  }
  0x26   : > { %199 = sbr.rel (%p196_p2) target bundleno = 266 (0x10a), region = 32  ;;  %s202_s30 = scalar_lea.sflag (!%p196_p2), [#allocation4], %s778_s28 }
  0x27   : > { %s490_s29 = smul.u32 (!%p196_p2), 80, %s778_s28 }
  0x29   : > { %s205_s5 = scalar_lea.vmem (!%p196_p2), [#allocation3], %s490_s29 }
  0x2b   : > { %637 = dma.done.wait (%p741_p8), %s202_s30, 1280  }
  0x2c   : > { %639 = vsyncadd (%p741_p8), %s202_s30, 4294966016  ;;  %v671_v0 = vmov 0.0   ;;  %v672_v1 = vmov 0   ;;  %v257_v2 = vld [vmem:[%s205_s5 + $0x48] sm:$0xff]  ;;  %v256_v3 = vld [vmem:[%s205_s5 + $0x40] sm:$0xff]  ;;  %vm258_vm0 = vcmask 326656  }
  0x2d   : > { %326 = vmatprep.mubr.f32.mxu0 %v671_v0  ;;  %557 = vset.pattern.permute.xlu0 %v672_v1  ;;  %v255_v4 = vld [vmem:[%s205_s5 + $0x38] sm:$0xff]  ;;  %v254_v5 = vld [vmem:[%s205_s5 + $0x30] sm:$0xff]  ;;  %v253_v6 = vld [vmem:[%s205_s5 + $0x28] sm:$0xff]  ;;  %s480_s8 = sshll.u32 %s778_s28, 4  ;;  %s487_s9 = sshll.u32 %s658_s15, 8 }
  0x2e   : > { %284 = vmatprep.subr.mxu0 %v257_v2  ;;  %v252_v7 = vld [vmem:[%s205_s5 + $0x20] sm:$0xff]  ;;  %v251_v9 = vld [vmem:[%s205_s5 + $0x18] sm:$0xff]  ;;  %v250_v10 = vld [vmem:[%s205_s5 + $0x10] sm:$0xff]  ;;  %s231_s10 = scalar_lea.vmem [#allocation6], %s480_s8  ;;  %s367_s21 = scalar_lea.hbm %s836_s3, %s487_s9 }
  0x2f   : > { %285 = vmatpush1.msra.mxu0 %v256_v3  ;;  %v342_v8 = vld [vmem:[%s835_s2] sm:$0xff]  ;;  %v249_v11 = vld [vmem:[%s205_s5 + $0x8] sm:$0xff]  ;;  %s369_s11 = sshll.u32 %s231_s10, 4  ;;  %s353_s22 = scalar_lea.sflag [#allocation5], %s778_s28  ;;  %s370_s11 = int_to_ptr.vmem [resolvable:$true] %s369_s11 }
  0x30   : > { %286 = vmatprep.subr.mxu0 %v255_v4  ;;  %345 = vperm.xlu0 %557, %v342_v8   ;;  %v248_v12 = vld [vmem:[%s205_s5] sm:$0xff]  ;;  %s586_s23 = scalar_lea.vmem %s370_s11, 256  ;;  %s673_s29 = smov [#allocation6]  }
  0x31   : > { %287 = vmatpush1.msra.mxu0 %v254_v5  ;;  %v247_v13 = vld [vmem:[%s834_s1] sm:$0xff]  ;;  %p587_p8 = scmp.ne.s32.totalorder %s370_s11, %s586_s23  ;;  %s590_s15 = sshll.u32 %s673_s29, 4  ;;  %s591_s15 = int_to_ptr.vmem [resolvable:$false] %s590_s15 }
  0x32   : > { %288 = vmatprep.subr.mxu0 %v253_v6  ;;  %s592_s30 = scalar_lea.vmem %s591_s15, 512  ;;  %p593_p1 = scmp.lt.s32.totalorder %s370_s11, %s591_s15 }
  0x33   : > { %289 = vmatpush1.msra.mxu0 %v252_v7  ;;  %p588_p12 = pnand %p587_p8, %p745_p9  ;;  %p594_p3 = scmp.lt.s32.totalorder %s592_s30, %s586_s23 }
  0x34   : > { %290 = vmatprep.subr.mxu0 %v251_v9 }
  0x35   : > { %291 = vmatpush1.msra.mxu0 %v250_v10  ;;  %p589_p0 = pneg %p588_p12  ;;  %p595_p5 = por %p594_p3, %p593_p1 }
  0x36   : > { %292 = vmatprep.subr.mxu0 %v249_v11 }
  0x37   : > { %293 = vmatpush1.msra.mxu0 %v248_v12  ;;  %p596_p6 = pnand %p595_p5, %p589_p0 }
  0x38   : > { %481 = vmatmul.mubr.msk.f32.vlgmr.msra.gmra.mxu0 %vm258_vm0, %v247_v13 }
  0xab   : > { %v346_v14 = vpop.permute.xlu0 %345 }
  0xf8   : > { %v328_v15 = vpop.f32.mrf.mxu0 }
  0xf9   : > { %v348_v16 = vadd.f32 %v346_v14, %v328_v15 }
  0xfa   : > { %v330_v17 = vpop.f32.mrf.mxu0 }
  0xfb   : > { %350 = vst [vmem:[%s231_s10] sm:$0xff] %v348_v16  ;;  %v349_v18 = vadd.f32 %v346_v14, %v330_v17 }
  0xfd   : > { %351 = vst [vmem:[%s231_s10 + $0x8] sm:$0xff] %v349_v18 }
  0xfe   : > { %599 = shalt.err (!%p596_p6)
}
  0xff   : > { %s600_s5 = scalar_lea.hbm %s367_s21, 256  ;;  %s604_s6 = scalar_lea.hbm %s836_s3, 512 }
 0x100   : > { %p601_p4 = scmp.ne.s32.totalorder %s367_s21, %s600_s5  ;;  %p605_p13 = scmp.lt.s32.totalorder %s367_s21, %s836_s3 }
 0x101   : > { %p606_p2 = scmp.lt.s32.totalorder %s604_s6, %s600_s5 }
 0x102   : > { %p602_p7 = pnand %p601_p4, %p745_p9 }
 0x103   : > { %p607_p8 = por %p606_p2, %p605_p13 }
 0x104   : > { %p603_p10 = pneg %p602_p7 }
 0x106   : > { %p608_p12 = pnand %p607_p8, %p603_p10 }
 0x108   : > { %611 = shalt.err (!%p608_p12)
}
 0x109   : > { %493 = dma.vmem_to_hbm [thread:$0]  (%p745_p9), %s370_s11, 256, %s367_s21, %s353_s22  }
 0x10a PF: > { %s381_s8 = sand.u32 1, %s646_s12   ;;  %p842_p0 = scmp.ge.s32.totalorder %s666_s17, 2 }
 0x10b   : > { %s382_s9 = scalar_lea.sflag [#allocation5], %s381_s8 }
 0x10c   : > { %p500_p1 = pnand %p842_p0, %p752_p11 }
 0x10e   : > { %p501_p3 = pneg %p500_p1 }
 0x110   : > { %641 = dma.done.wait (%p501_p3), %s382_s9, 256  }
 0x111   : > { %643 = vsyncadd (%p501_p3), %s382_s9, 4294967040  ;;  %s19_s17 = sadd.s32 1, %s666_s17   ;;  %s843_s12 = smov %s650_s13 }
 0x112   : > { %p16_p5 = scmp.ge.s32.totalorder %s19_s17, 4   ;;  %s844_s13 = smov %s654_s14 }
 0x113   : > { %s845_s14 = smov %s750_s26  ;;  %s846_s15 = smov %s662_s16 }
 0x114   : > { %s847_s16 = smov %s849_s20  ;;  %18 = sbr.rel (!%p16_p5) target bundleno = 6 (0x6), region = 88 }
 0x119   :  { %387 = vsyncpa [#allocation4], 1 }
 0x11a   :  { %389 = vsyncpa [#allocation4 + $0x1], 1 }
 0x11b   :  { %390 = vsyncpa [#allocation5], 1 }
 0x11c   :  { %392 = vsyncpa [#allocation5 + $0x1], 1 }

</bundles_post_ra>
